<compile_context>
chip_gen: v7x
topology: tpu7x:2x2x1
jax: 0.10.0
libtpu: 0.0.40
codegen_flags: <defaults>
</compile_context>

<pallas_src>
import functools

import jax
import jax.numpy as jnp
from jax.experimental import pallas as pl
from jax.experimental.pallas import tpu as pltpu

_LANES = 128


def _proj_kernel(x_ref, w1_ref, b1_ref, w2_ref, b2_ref, proj_ref, acc_ref,
                 *, inv_hw, n_chunks):
    """Fused global-avg-pool (tiled spatial reduction) + Linear->ReLU->Linear.

    x_ref   : [TB, C, THW]      input tile (native dtype), THW on lanes
    w1_ref  : [C, HID]          resident
    b1_ref  : [1, HID]          f32, resident
    w2_ref  : [HID, PROJ_PAD]   resident (zero-padded to lane width)
    b2_ref  : [1, PROJ_PAD]     f32, resident (zero-padded)
    proj_ref: [TB, PROJ_PAD]    f32 output block (constant across the hw axis)
    acc_ref : [TB, C, 128]      f32 lane-preserving partial-sum scratch

    The pooled representation (dunce_net tuple element [1]) lives only in
    acc_ref / vregs and is never written back — the module discards it.
    """
    k = pl.program_id(1)
    nk = pl.num_programs(1)

    # Lane-preserving partial sums: plain VPU adds over 128-wide lane chunks,
    # no per-tile cross-lane (XLU) reduce and no per-tile relayout.  The f32
    # cast is narrowed to one chunk at a time.
    s = x_ref[:, :, pl.ds(0, _LANES)].astype(jnp.float32)
    for j in range(1, n_chunks):                       # static, fully unrolled
        s = s + x_ref[:, :, pl.ds(j * _LANES, _LANES)].astype(jnp.float32)

    @pl.when(k == 0)
    def _init():
        acc_ref[...] = s

    @pl.when(k > 0)
    def _accum():
        acc_ref[...] += s

    # Finalize: one cross-lane reduce per batch tile + projector MLP.  proj_ref
    # stays resident across the "arbitrary" spatial axis (its index_map ignores
    # k), so writing only at the last step is safe.
    @pl.when(k == nk - 1)
    def _finalize():
        pooled = jnp.sum(acc_ref[...], axis=-1) * inv_hw            # [TB, C] f32
        h = jnp.dot(pooled.astype(w1_ref.dtype), w1_ref[...],
                    preferred_element_type=jnp.float32) + b1_ref[...]
        h = jnp.maximum(h, 0.0)                                     # ReLU (f32)
        y = jnp.dot(h.astype(w2_ref.dtype), w2_ref[...],
                    preferred_element_type=jnp.float32) + b2_ref[...]
        proj_ref[...] = y.astype(proj_ref.dtype)


def _vmem_plan():
    """Returns (tiling byte budget, vmem_limit_bytes or None, target tb, is_v7x)."""
    try:
        kind = jax.devices()[0].device_kind.lower()
    except Exception:
        kind = ""
    if "v6" in kind or "v5e" in kind or "v5 lite" in kind or "v5lite" in kind:
        # 128 MiB physical VMEM: raise well past the 32 MiB scoped default.
        return 80 * 2**20, 100 * 2**20, 256 if "v6" in kind else 128, False
    if "7" in kind:
        # v7x: 64 MiB physical / 32 MiB scoped default; stay <= ~56 MiB.
        return 44 * 2**20, 56 * 2**20, 256, True
    if "v4" in kind or "v5" in kind:
        return 48 * 2**20, 64 * 2**20, 128, False
    return 12 * 2**20, None, 64, False     # unknown / interpret: conservative


def _divisors(n):
    return [d for d in range(1, n + 1) if n % d == 0]


def _choose_tiles(B, C, hw_pad, x_itemsize, proj_pad, resident_bytes, budget,
                  target_tb, prefer_two_batch_tiles):
    """Pick (tb, thw) from a VMEM byte budget instead of divisibility alone."""
    # tb must keep the output block (tb, proj_pad) layout-legal: tb % 8 == 0 or tb == B.
    tb_cands = sorted([d for d in _divisors(B)
                       if d <= target_tb and (d % 8 == 0 or d == B)],
                      reverse=True)
    if not tb_cands:
        tb_cands = [B]
    if prefer_two_batch_tiles:
        # v7x: prefer nb >= 2 so the "parallel" batch axis shards over 2 TCs.
        two = [d for d in tb_cands if B // d >= 2]
        tb_cands = two + [d for d in tb_cands if d not in two]

    # thw: multiples of 128 dividing hw_pad (capped so per-step tiles stay sane).
    nlc = hw_pad // _LANES
    thw_cands = sorted([_LANES * d for d in _divisors(nlc) if _LANES * d <= 2048],
                       reverse=True)

    def fits(tb, thw):
        x_buf = 2 * tb * C * thw * x_itemsize      # double-buffered input tile
        acc = tb * C * _LANES * 4                  # f32 partial-sum scratch
        out = 2 * tb * proj_pad * 4                # output block
        return x_buf + acc + out + resident_bytes <= budget

    for tb in tb_cands:
        for thw in thw_cands:
            if fits(tb, thw):
                return tb, thw
    return tb_cands[-1], _LANES                    # pathological fallback


def prepare_params(params, weight_dtype=None):
    """One-time parameter prep, hoisted out of the per-call path:
      * biases reshaped to [1, N] f32,
      * W2/b2 columns zero-padded up to a lane-dense multiple of 128,
      * optional weight cast (bf16 recommended for real BYOL sizes on v6e/v7x;
        f32 kept here so the toy test matches the f32 reference exactly)."""
    w1, b1, w2, b2 = params
    hid, proj = w2.shape
    proj_pad = max(_LANES, ((proj + _LANES - 1) // _LANES) * _LANES)
    b1 = jnp.asarray(b1, jnp.float32).reshape(1, -1)
    b2 = jnp.asarray(b2, jnp.float32).reshape(1, -1)
    if proj_pad != proj:
        w2p = jnp.zeros((hid, proj_pad), w2.dtype).at[:, :proj].set(w2)
        b2p = jnp.zeros((1, proj_pad), jnp.float32).at[:, :proj].set(b2)
    else:
        w2p, b2p = w2, b2
    if weight_dtype is not None:
        w1 = w1.astype(weight_dtype)
        w2p = w2p.astype(weight_dtype)
    return (w1, b1, w2p, b2p, proj)


def fix_nine_year_old_coders_junk(x, prepared_params):
    """Exact analogue of FixNineYearOldCodersJunk.forward: dunce_net(x)[0].

    Only the projection (tuple element [0]) is computed & written back.
    """
    w1, b1, w2p, b2p, proj = prepared_params
    B, C, H, W = x.shape
    HW = H * W
    hid = w1.shape[1]
    proj_pad = w2p.shape[1]

    budget, vmem_limit, target_tb, is_v7x = _vmem_plan()

    # Spatial axis: flatten (no dtype cast — DMA native dtype, cast in-kernel)
    # and zero-pad to a multiple of 128 lanes; zeros don't change the sum and
    # the true 1/(H*W) is used for the mean.
    # TODO(synk): mask the ragged tail in-kernel instead of this zero-pad pass.
    x3 = x.reshape(B, C, HW)
    hw_pad = max(_LANES, ((HW + _LANES - 1) // _LANES) * _LANES)
    if hw_pad != HW:
        x3 = jnp.pad(x3, ((0, 0), (0, 0), (0, hw_pad - HW)))

    resident_bytes = 2 * (w1.size * w1.dtype.itemsize + b1.size * 4
                          + w2p.size * w2p.dtype.itemsize + b2p.size * 4)
    tb, thw = _choose_tiles(B, C, hw_pad, x3.dtype.itemsize, proj_pad,
                            resident_bytes, budget, target_tb, is_v7x)
    nb, nk = B // tb, hw_pad // thw

    cost = pl.CostEstimate(
        flops=int(B * C * HW + 2 * B * (C * hid + hid * proj_pad)),
        transcendentals=0,
        bytes_accessed=int(x3.size * x3.dtype.itemsize + resident_bytes // 2
                           + B * proj_pad * 4),
    )

    def build(single_buffer_weights):
        def w_spec(shape):
            if single_buffer_weights:
                # Constant index_map => double-buffering buys nothing; halve
                # the resident-weight VMEM footprint.
                return pl.BlockSpec(shape, lambda i, k: (0,) * len(shape),
                                    pipeline_mode=pl.Buffered(1))
            return pl.BlockSpec(shape, lambda i, k: (0,) * len(shape))

        return pl.pallas_call(
            functools.partial(_proj_kernel, inv_hw=1.0 / HW,
                              n_chunks=thw // _LANES),
            out_shape=jax.ShapeDtypeStruct((B, proj_pad), jnp.float32),
            grid=(nb, nk),                        # (batch tiles, spatial tiles)
            in_specs=[
                pl.BlockSpec((tb, C, thw), lambda i, k: (i, 0, k)),   # x tile
                w_spec((C, hid)),                                     # W1
                w_spec((1, hid)),                                     # b1
                w_spec((hid, proj_pad)),                              # W2 (padded)
                w_spec((1, proj_pad)),                                # b2 (padded)
            ],
            out_specs=pl.BlockSpec((tb, proj_pad), lambda i, k: (i, 0)),
            scratch_shapes=[pltpu.VMEM((tb, C, _LANES), jnp.float32)],
            compiler_params=pltpu.CompilerParams(
                dimension_semantics=("parallel", "arbitrary"),
                vmem_limit_bytes=vmem_limit,
            ),
            cost_estimate=cost,
        )

    try:
        out = build(single_buffer_weights=True)(x3, w1, b1, w2p, b2p)
    except Exception:
        # JAX builds without BlockSpec.pipeline_mode support for pallas_call:
        # fall back to default (double-buffered) resident weights.
        out = build(single_buffer_weights=False)(x3, w1, b1, w2p, b2p)

    return out[:, :proj]


def make_params(key, c_in, hidden, proj_dim):
    k1, k2, k3, k4 = jax.random.split(key, 4)
    w1 = jax.random.normal(k1, (c_in, hidden), jnp.float32) * 0.1
    b1 = jax.random.normal(k2, (1, hidden), jnp.float32) * 0.01
    w2 = jax.random.normal(k3, (hidden, proj_dim), jnp.float32) * 0.1
    b2 = jax.random.normal(k4, (1, proj_dim), jnp.float32) * 0.01
    return (w1, b1, w2, b2)


def _reference(x, params):
    # Pure-JAX reference: dunce_net(x)[0]
    w1, b1, w2, b2 = params
    B, C, H, W = x.shape
    pooled = jnp.mean(x.reshape(B, C, H * W).astype(jnp.float32), axis=-1)
    h = jnp.maximum(pooled @ w1 + b1, 0.0)
    return h @ w2 + b2


if __name__ == "__main__":
    key = jax.random.PRNGKey(0)
    kx, kp = jax.random.split(key)

    B, C, H, W = 2, 4, 16, 16
    HIDDEN, PROJ = 32, 16

    x = jax.random.normal(kx, (B, C, H, W), jnp.float32)
    params = make_params(kp, C, HIDDEN, PROJ)
    prepared = prepare_params(params)     # W2/b2 padding hoisted out of the call path

    out = fix_nine_year_old_coders_junk(x, prepared)
    out = jax.block_until_ready(out)

    ref = _reference(x, params)
    assert out.shape == (B, PROJ)
    assert jnp.allclose(out, ref, atol=1e-4, rtol=1e-4)

    print("KERNEL_OK")
</pallas_src>

<mosaic_0001>
module attributes {stable_mosaic.version = 11 : i64} {
  func.func @_proj_kernel(%arg0: i32, %arg1: i32, %arg2: memref<2x4x256xf32, #tpu.memory_space<vmem>>, %arg3: memref<4x32xf32, #tpu.memory_space<vmem>>, %arg4: memref<1x32xf32, #tpu.memory_space<vmem>>, %arg5: memref<32x128xf32, #tpu.memory_space<vmem>>, %arg6: memref<1x128xf32, #tpu.memory_space<vmem>>, %arg7: memref<2x128xf32, #tpu.memory_space<vmem>>, %arg8: memref<2x4x128xf32, #tpu.memory_space<vmem>>) attributes {dimension_semantics = [#tpu.dimension_semantics<parallel>, #tpu.dimension_semantics<arbitrary>], iteration_bounds = array<i64: 1, 1>, scalar_prefetch = 0 : i64, scratch_operands = 1 : i64, tpu.core_type = #tpu.core_type<tc>, window_params = [{transform_indices = @transform_0, window_bounds = array<i64: 2, 4, 256>}, {pipeline_mode = #tpu.pipeline_mode<synchronous>, transform_indices = @transform_1, window_bounds = array<i64: 4, 32>}, {pipeline_mode = #tpu.pipeline_mode<synchronous>, transform_indices = @transform_2, window_bounds = array<i64: 1, 32>}, {pipeline_mode = #tpu.pipeline_mode<synchronous>, transform_indices = @transform_3, window_bounds = array<i64: 32, 128>}, {pipeline_mode = #tpu.pipeline_mode<synchronous>, transform_indices = @transform_4, window_bounds = array<i64: 1, 128>}, {transform_indices = @transform_5, window_bounds = array<i64: 2, 128>}]} {
    %c0 = arith.constant 0 : index
    %c0_0 = arith.constant 0 : index
    %c0_1 = arith.constant 0 : index
    %0 = vector.load %arg2[%c0, %c0_0, %c0_1] : memref<2x4x256xf32, #tpu.memory_space<vmem>>, vector<2x4x128xf32>
    %c0_2 = arith.constant 0 : index
    %c0_3 = arith.constant 0 : index
    %c128 = arith.constant 128 : index
    %1 = vector.load %arg2[%c0_2, %c0_3, %c128] : memref<2x4x256xf32, #tpu.memory_space<vmem>>, vector<2x4x128xf32>
    %2 = arith.addf %0, %1 : vector<2x4x128xf32>
    %c0_i32 = arith.constant 0 : i32
    %3 = arith.cmpi eq, %arg1, %c0_i32 : i32
    %4 = arith.extui %3 : i1 to i32
    %c0_i32_4 = arith.constant 0 : i32
    %5 = arith.cmpi ne, %4, %c0_i32_4 : i32
    scf.if %5 {
      %c0_9 = arith.constant 0 : index
      %c0_10 = arith.constant 0 : index
      %c0_11 = arith.constant 0 : index
      %12 = vector.load %arg8[%c0_9, %c0_10, %c0_11] : memref<2x4x128xf32, #tpu.memory_space<vmem>>, vector<2x4x128xf32>
      tpu.vector_store %arg8[%c0_9, %c0_10, %c0_11], %2 {strides = array<i32>} : memref<2x4x128xf32, #tpu.memory_space<vmem>>, vector<2x4x128xf32>,
    } else {
    }
    %c0_i32_5 = arith.constant 0 : i32
    %6 = arith.cmpi sgt, %arg1, %c0_i32_5 : i32
    %7 = arith.extui %6 : i1 to i32
    %c0_i32_6 = arith.constant 0 : i32
    %8 = arith.cmpi ne, %7, %c0_i32_6 : i32
    scf.if %8 {
      %c0_9 = arith.constant 0 : index
      %c0_10 = arith.constant 0 : index
      %c0_11 = arith.constant 0 : index
      %12 = vector.load %arg8[%c0_9, %c0_10, %c0_11] : memref<2x4x128xf32, #tpu.memory_space<vmem>>, vector<2x4x128xf32>
      %13 = arith.addf %12, %2 : vector<2x4x128xf32>
      %c0_12 = arith.constant 0 : index
      %c0_13 = arith.constant 0 : index
      %c0_14 = arith.constant 0 : index
      %14 = vector.load %arg8[%c0_12, %c0_13, %c0_14] : memref<2x4x128xf32, #tpu.memory_space<vmem>>, vector<2x4x128xf32>
      tpu.vector_store %arg8[%c0_12, %c0_13, %c0_14], %13 {strides = array<i32>} : memref<2x4x128xf32, #tpu.memory_space<vmem>>, vector<2x4x128xf32>,
    } else {
    }
    %c0_i32_7 = arith.constant 0 : i32
    %9 = arith.cmpi eq, %arg1, %c0_i32_7 : i32
    %10 = arith.extui %9 : i1 to i32
    %c0_i32_8 = arith.constant 0 : i32
    %11 = arith.cmpi ne, %10, %c0_i32_8 : i32
    scf.if %11 {
      %c0_9 = arith.constant 0 : index
      %c0_10 = arith.constant 0 : index
      %c0_11 = arith.constant 0 : index
      %12 = vector.load %arg8[%c0_9, %c0_10, %c0_11] : memref<2x4x128xf32, #tpu.memory_space<vmem>>, vector<2x4x128xf32>
      %cst = arith.constant dense<0.000000e+00> : vector<2x4xf32>
      %13 = vector.multi_reduction <add>, %12, %cst [2] : vector<2x4x128xf32> to vector<2x4xf32>
      %cst_12 = arith.constant 3.906250e-03 : f32
      %14 = vector.broadcast %cst_12 : f32 to vector<2x4xf32>
      %15 = arith.mulf %13, %14 : vector<2x4xf32>
      %c0_13 = arith.constant 0 : index
      %c0_14 = arith.constant 0 : index
      %16 = vector.load %arg3[%c0_13, %c0_14] : memref<4x32xf32, #tpu.memory_space<vmem>>, vector<4x32xf32>
      %cst_15 = arith.constant dense<0.000000e+00> : vector<2x32xf32>
      %17 = tpu.matmul %15, %16, %cst_15 {dimension_numbers = #tpu.dot_dimension_numbers<[1], [0], [0], [1], [0, 0, 1, 1], [], []>} : vector<2x4xf32>, vector<4x32xf32>, vector<2x32xf32> -> vector<2x32xf32>
      %c0_16 = arith.constant 0 : index
      %c0_17 = arith.constant 0 : index
      %18 = vector.load %arg4[%c0_16, %c0_17] : memref<1x32xf32, #tpu.memory_space<vmem>>, vector<1x32xf32>
      %19 = vector.broadcast %18 : vector<1x32xf32> to vector<2x32xf32>
      %20 = arith.addf %17, %19 : vector<2x32xf32>
      %cst_18 = arith.constant 0.000000e+00 : f32
      %21 = vector.broadcast %cst_18 : f32 to vector<2x32xf32>
      %22 = arith.maximumf %20, %21 : vector<2x32xf32>
      %c0_19 = arith.constant 0 : index
      %c0_20 = arith.constant 0 : index
      %23 = vector.load %arg5[%c0_19, %c0_20] : memref<32x128xf32, #tpu.memory_space<vmem>>, vector<32x128xf32>
      %cst_21 = arith.constant dense<0.000000e+00> : vector<2x128xf32>
      %24 = tpu.matmul %22, %23, %cst_21 {dimension_numbers = #tpu.dot_dimension_numbers<[1], [0], [0], [1], [0, 0, 1, 1], [], []>} : vector<2x32xf32>, vector<32x128xf32>, vector<2x128xf32> -> vector<2x128xf32>
      %c0_22 = arith.constant 0 : index
      %c0_23 = arith.constant 0 : index
      %25 = vector.load %arg6[%c0_22, %c0_23] : memref<1x128xf32, #tpu.memory_space<vmem>>, vector<1x128xf32>
      %26 = vector.broadcast %25 : vector<1x128xf32> to vector<2x128xf32>
      %27 = arith.addf %24, %26 : vector<2x128xf32>
      %c0_24 = arith.constant 0 : index
      %c0_25 = arith.constant 0 : index
      %28 = vector.load %arg7[%c0_24, %c0_25] : memref<2x128xf32, #tpu.memory_space<vmem>>, vector<2x128xf32>
      tpu.vector_store %arg7[%c0_24, %c0_25], %27 {strides = array<i32>} : memref<2x128xf32, #tpu.memory_space<vmem>>, vector<2x128xf32>,
    } else {
    }
    return
  }
  func.func @transform_0(%arg0: i32, %arg1: i32) -> (i32, i32, i32) {
    %c0_i32 = arith.constant 0 : i32
    %c0_i32_0 = arith.constant 0 : i32
    return %arg0, %c0_i32, %arg1 : i32, i32, i32
  }
  func.func @transform_1(%arg0: i32, %arg1: i32) -> (i32, i32) {
    %c0_i32 = arith.constant 0 : i32
    %c0_i32_0 = arith.constant 0 : i32
    %c0_i32_1 = arith.constant 0 : i32
    return %c0_i32, %c0_i32_0 : i32, i32
  }
  func.func @transform_2(%arg0: i32, %arg1: i32) -> (i32, i32) {
    %c0_i32 = arith.constant 0 : i32
    %c0_i32_0 = arith.constant 0 : i32
    %c0_i32_1 = arith.constant 0 : i32
    return %c0_i32, %c0_i32_0 : i32, i32
  }
  func.func @transform_3(%arg0: i32, %arg1: i32) -> (i32, i32) {
    %c0_i32 = arith.constant 0 : i32
    %c0_i32_0 = arith.constant 0 : i32
    %c0_i32_1 = arith.constant 0 : i32
    return %c0_i32, %c0_i32_0 : i32, i32
  }
  func.func @transform_4(%arg0: i32, %arg1: i32) -> (i32, i32) {
    %c0_i32 = arith.constant 0 : i32
    %c0_i32_0 = arith.constant 0 : i32
    %c0_i32_1 = arith.constant 0 : i32
    return %c0_i32, %c0_i32_0 : i32, i32
  }
  func.func @transform_5(%arg0: i32, %arg1: i32) -> (i32, i32) {
    %c0_i32 = arith.constant 0 : i32
    %c0_i32_0 = arith.constant 0 : i32
    return %arg0, %c0_i32 : i32, i32
  }
}

module attributes {stable_mosaic.version = 11 : i64} {
  func.func @_proj_kernel(%arg0: i32, %arg1: i32, %arg2: memref<2x4x256xf32, #tpu.memory_space<vmem>>, %arg3: memref<4x32xf32, #tpu.memory_space<vmem>>, %arg4: memref<1x32xf32, #tpu.memory_space<vmem>>, %arg5: memref<32x128xf32, #tpu.memory_space<vmem>>, %arg6: memref<1x128xf32, #tpu.memory_space<vmem>>, %arg7: memref<2x128xf32, #tpu.memory_space<vmem>>, %arg8: memref<2x4x128xf32, #tpu.memory_space<vmem>>) attributes {dimension_semantics = [#tpu.dimension_semantics<parallel>, #tpu.dimension_semantics<arbitrary>], iteration_bounds = array<i64: 1, 1>, scalar_prefetch = 0 : i64, scratch_operands = 1 : i64, tpu.core_type = #tpu.core_type<tc>, window_params = [{transform_indices = @transform_0, window_bounds = array<i64: 2, 4, 256>}, {pipeline_mode = #tpu.pipeline_mode<synchronous>, transform_indices = @transform_1, window_bounds = array<i64: 4, 32>}, {pipeline_mode = #tpu.pipeline_mode<synchronous>, transform_indices = @transform_2, window_bounds = array<i64: 1, 32>}, {pipeline_mode = #tpu.pipeline_mode<synchronous>, transform_indices = @transform_3, window_bounds = array<i64: 32, 128>}, {pipeline_mode = #tpu.pipeline_mode<synchronous>, transform_indices = @transform_4, window_bounds = array<i64: 1, 128>}, {transform_indices = @transform_5, window_bounds = array<i64: 2, 128>}]} {
    %c0 = arith.constant 0 : index
    %c0_0 = arith.constant 0 : index
    %c0_1 = arith.constant 0 : index
    %0 = vector.load %arg2[%c0, %c0_0, %c0_1] : memref<2x4x256xf32, #tpu.memory_space<vmem>>, vector<2x4x128xf32>
    %c0_2 = arith.constant 0 : index
    %c0_3 = arith.constant 0 : index
    %c128 = arith.constant 128 : index
    %1 = vector.load %arg2[%c0_2, %c0_3, %c128] : memref<2x4x256xf32, #tpu.memory_space<vmem>>, vector<2x4x128xf32>
    %2 = arith.addf %0, %1 : vector<2x4x128xf32>
    %c0_i32 = arith.constant 0 : i32
    %3 = arith.cmpi eq, %arg1, %c0_i32 : i32
    %4 = arith.extui %3 : i1 to i32
    %c0_i32_4 = arith.constant 0 : i32
    %5 = arith.cmpi ne, %4, %c0_i32_4 : i32
    scf.if %5 {
      %c0_9 = arith.constant 0 : index
      %c0_10 = arith.constant 0 : index
      %c0_11 = arith.constant 0 : index
      %12 = vector.load %arg8[%c0_9, %c0_10, %c0_11] : memref<2x4x128xf32, #tpu.memory_space<vmem>>, vector<2x4x128xf32>
      tpu.vector_store %arg8[%c0_9, %c0_10, %c0_11], %2 {strides = array<i32>} : memref<2x4x128xf32, #tpu.memory_space<vmem>>, vector<2x4x128xf32>,
    } else {
    }
    %c0_i32_5 = arith.constant 0 : i32
    %6 = arith.cmpi sgt, %arg1, %c0_i32_5 : i32
    %7 = arith.extui %6 : i1 to i32
    %c0_i32_6 = arith.constant 0 : i32
    %8 = arith.cmpi ne, %7, %c0_i32_6 : i32
    scf.if %8 {
      %c0_9 = arith.constant 0 : index
      %c0_10 = arith.constant 0 : index
      %c0_11 = arith.constant 0 : index
      %12 = vector.load %arg8[%c0_9, %c0_10, %c0_11] : memref<2x4x128xf32, #tpu.memory_space<vmem>>, vector<2x4x128xf32>
      %13 = arith.addf %12, %2 : vector<2x4x128xf32>
      %c0_12 = arith.constant 0 : index
      %c0_13 = arith.constant 0 : index
      %c0_14 = arith.constant 0 : index
      %14 = vector.load %arg8[%c0_12, %c0_13, %c0_14] : memref<2x4x128xf32, #tpu.memory_space<vmem>>, vector<2x4x128xf32>
      tpu.vector_store %arg8[%c0_12, %c0_13, %c0_14], %13 {strides = array<i32>} : memref<2x4x128xf32, #tpu.memory_space<vmem>>, vector<2x4x128xf32>,
    } else {
    }
    %c0_i32_7 = arith.constant 0 : i32
    %9 = arith.cmpi eq, %arg1, %c0_i32_7 : i32
    %10 = arith.extui %9 : i1 to i32
    %c0_i32_8 = arith.constant 0 : i32
    %11 = arith.cmpi ne, %10, %c0_i32_8 : i32
    scf.if %11 {
      %c0_9 = arith.constant 0 : index
      %c0_10 = arith.constant 0 : index
      %c0_11 = arith.constant 0 : index
      %12 = vector.load %arg8[%c0_9, %c0_10, %c0_11] : memref<2x4x128xf32, #tpu.memory_space<vmem>>, vector<2x4x128xf32>
      %cst = arith.constant dense<0.000000e+00> : vector<2x4xf32>
      %13 = vector.multi_reduction <add>, %12, %cst [2] : vector<2x4x128xf32> to vector<2x4xf32>
      %cst_12 = arith.constant 3.906250e-03 : f32
      %14 = vector.broadcast %cst_12 : f32 to vector<2x4xf32>
      %15 = arith.mulf %13, %14 : vector<2x4xf32>
      %c0_13 = arith.constant 0 : index
      %c0_14 = arith.constant 0 : index
      %16 = vector.load %arg3[%c0_13, %c0_14] : memref<4x32xf32, #tpu.memory_space<vmem>>, vector<4x32xf32>
      %cst_15 = arith.constant dense<0.000000e+00> : vector<2x32xf32>
      %17 = tpu.matmul %15, %16, %cst_15 {dimension_numbers = #tpu.dot_dimension_numbers<[1], [0], [0], [1], [0, 0, 1, 1], [], []>} : vector<2x4xf32>, vector<4x32xf32>, vector<2x32xf32> -> vector<2x32xf32>
      %c0_16 = arith.constant 0 : index
      %c0_17 = arith.constant 0 : index
      %18 = vector.load %arg4[%c0_16, %c0_17] : memref<1x32xf32, #tpu.memory_space<vmem>>, vector<1x32xf32>
      %19 = vector.broadcast %18 : vector<1x32xf32> to vector<2x32xf32>
      %20 = arith.addf %17, %19 : vector<2x32xf32>
      %cst_18 = arith.constant 0.000000e+00 : f32
      %21 = vector.broadcast %cst_18 : f32 to vector<2x32xf32>
      %22 = arith.maximumf %20, %21 : vector<2x32xf32>
      %c0_19 = arith.constant 0 : index
      %c0_20 = arith.constant 0 : index
      %23 = vector.load %arg5[%c0_19, %c0_20] : memref<32x128xf32, #tpu.memory_space<vmem>>, vector<32x128xf32>
      %cst_21 = arith.constant dense<0.000000e+00> : vector<2x128xf32>
      %24 = tpu.matmul %22, %23, %cst_21 {dimension_numbers = #tpu.dot_dimension_numbers<[1], [0], [0], [1], [0, 0, 1, 1], [], []>} : vector<2x32xf32>, vector<32x128xf32>, vector<2x128xf32> -> vector<2x128xf32>
      %c0_22 = arith.constant 0 : index
      %c0_23 = arith.constant 0 : index
      %25 = vector.load %arg6[%c0_22, %c0_23] : memref<1x128xf32, #tpu.memory_space<vmem>>, vector<1x128xf32>
      %26 = vector.broadcast %25 : vector<1x128xf32> to vector<2x128xf32>
      %27 = arith.addf %24, %26 : vector<2x128xf32>
      %c0_24 = arith.constant 0 : index
      %c0_25 = arith.constant 0 : index
      %28 = vector.load %arg7[%c0_24, %c0_25] : memref<2x128xf32, #tpu.memory_space<vmem>>, vector<2x128xf32>
      tpu.vector_store %arg7[%c0_24, %c0_25], %27 {strides = array<i32>} : memref<2x128xf32, #tpu.memory_space<vmem>>, vector<2x128xf32>,
    } else {
    }
    return
  }
  func.func @transform_0(%arg0: i32, %arg1: i32) -> (i32, i32, i32) {
    %c0_i32 = arith.constant 0 : i32
    %c0_i32_0 = arith.constant 0 : i32
    return %arg0, %c0_i32, %arg1 : i32, i32, i32
  }
  func.func @transform_1(%arg0: i32, %arg1: i32) -> (i32, i32) {
    %c0_i32 = arith.constant 0 : i32
    %c0_i32_0 = arith.constant 0 : i32
    %c0_i32_1 = arith.constant 0 : i32
    return %c0_i32, %c0_i32_0 : i32, i32
  }
  func.func @transform_2(%arg0: i32, %arg1: i32) -> (i32, i32) {
    %c0_i32 = arith.constant 0 : i32
    %c0_i32_0 = arith.constant 0 : i32
    %c0_i32_1 = arith.constant 0 : i32
    return %c0_i32, %c0_i32_0 : i32, i32
  }
  func.func @transform_3(%arg0: i32, %arg1: i32) -> (i32, i32) {
    %c0_i32 = arith.constant 0 : i32
    %c0_i32_0 = arith.constant 0 : i32
    %c0_i32_1 = arith.constant 0 : i32
    return %c0_i32, %c0_i32_0 : i32, i32
  }
  func.func @transform_4(%arg0: i32, %arg1: i32) -> (i32, i32) {
    %c0_i32 = arith.constant 0 : i32
    %c0_i32_0 = arith.constant 0 : i32
    %c0_i32_1 = arith.constant 0 : i32
    return %c0_i32, %c0_i32_0 : i32, i32
  }
  func.func @transform_5(%arg0: i32, %arg1: i32) -> (i32, i32) {
    %c0_i32 = arith.constant 0 : i32
    %c0_i32_0 = arith.constant 0 : i32
    return %arg0, %c0_i32 : i32, i32
  }
}

</mosaic_0001>

<bundles_post_ra>
// kernel: tpu_custom_call.1
= control target key start
LH: loop header
LB: loop body
LE: loop exit
PB: predicated region body
PF: predicated region fallthrough
CT: control target
= control target key end

     0   :  { %10 = vsyncpa [#allocation4], 0  ;;  %s534_s0 = inlined_call_operand.hbm [shape: f32[2,4,256], index: 0, kind: input, shape index: {}]   ;;  %s535_s1 = inlined_call_operand.hbm [shape: f32[4,32], index: 1, kind: input, shape index: {}]   ;;  %s536_s2 = inlined_call_operand.vmem [shape: f32[1,32], index: 2, kind: input, shape index: {}]   ;;  %s537_s3 = inlined_call_operand.hbm [shape: f32[32,128], index: 3, kind: input, shape index: {}]   ;;  %s538_s4 = inlined_call_operand.vmem [shape: f32[1,128], index: 4, kind: input, shape index: {}]   ;;  %s539_s5 = inlined_call_operand.hbm [shape: f32[2,128], index: 5, kind: output, shape index: {}]  }
   0x1   :  { %11 = vsyncpa [#allocation7], 0 }
   0x2   :  { %12 = vsyncpa [#allocation5], 0  ;;  %s434_s18 = smov [#allocation6]   ;;  %s435_s20 = smov [#allocation3]  }
   0x3   :  { %s31_s19 = sshll.u32 %s434_s18, 4  ;;  %s18_s21 = sshll.u32 %s435_s20, 4  ;;  %s32_s19 = int_to_ptr.vmem [resolvable:$true] %s31_s19  ;;  %s473_s21 = int_to_ptr.vmem [resolvable:$true] %s18_s21 }
   0x4   :  { %s340_s24 = scalar_lea.hbm %s535_s1, 64 }
   0x5   :  { %p341_p0 = scmp.ne.s32.totalorder %s535_s1, %s340_s24  ;;  %p344_p1 = scmp.lt.u32.totalorder %s340_s24, %s535_s1 }
   0x7   :  { %p346_p2 = pnand %p344_p1, %p341_p0 }
   0x9   :  { %349 = shalt.err (!%p346_p2)
}
   0xa   :  { %s350_s29 = scalar_lea.vmem %s32_s19, 64  ;;  %p355_p4 = scmp.lt.s32.totalorder %s32_s19, %s32_s19 }
   0xb   :  { %p351_p3 = scmp.ne.s32.totalorder %s32_s19, %s350_s29  ;;  %p356_p5 = scmp.lt.s32.totalorder %s350_s29, %s350_s29 }
   0xd   :  { %p357_p6 = por %p356_p5, %p355_p4 }
   0xf   :  { %p358_p7 = pnand %p357_p6, %p351_p3 }
  0x11   :  { %361 = shalt.err (!%p358_p7)
}
  0x12   :  { %34 = dma.hbm_to_vmem [thread:$0]  %s535_s1, 64, %s32_s19, [#allocation7]  }
  0x13   :  { %s362_s9 = scalar_lea.hbm %s534_s0, 256 }
  0x14   :  { %p363_p8 = scmp.ne.s32.totalorder %s534_s0, %s362_s9  ;;  %p366_p9 = scmp.lt.u32.totalorder %s362_s9, %s534_s0 }
  0x16   :  { %p368_p10 = pnand %p366_p9, %p363_p8 }
  0x18   :  { %371 = shalt.err (!%p368_p10)
}
  0x19   :  { %s372_s14 = scalar_lea.vmem %s473_s21, 256  ;;  %p377_p12 = scmp.lt.s32.totalorder %s473_s21, %s473_s21 }
  0x1a   :  { %p373_p11 = scmp.ne.s32.totalorder %s473_s21, %s372_s14  ;;  %p378_p13 = scmp.lt.s32.totalorder %s372_s14, %s372_s14 }
  0x1c   :  { %p379_p0 = por %p378_p13, %p377_p12 }
  0x1e   :  { %p380_p1 = pnand %p379_p0, %p373_p11 }
  0x20   :  { %383 = shalt.err (!%p380_p1)
}
  0x21   :  { %s436_s1 = smov 128   ;;  %s437_s15 = smov 8  }
  0x22   :  { %24 = dma.hbm_to_vmem [thread:$0]  %s534_s0, 256, %s473_s21, [#allocation4], %s436_s1, %s436_s1, %s437_s15  }
  0x23   :  { %s438_s18 = smov [#allocation8]   ;;  %s384_s23 = scalar_lea.hbm %s537_s3, 512 }
  0x24   :  { %s42_s19 = sshll.u32 %s438_s18, 4  ;;  %p385_p2 = scmp.ne.s32.totalorder %s537_s3, %s384_s23  ;;  %s43_s19 = int_to_ptr.vmem [resolvable:$true] %s42_s19 }
  0x25   :  { %p388_p3 = scmp.lt.u32.totalorder %s384_s23, %s537_s3 }
  0x27   :  { %p390_p4 = pnand %p388_p3, %p385_p2 }
  0x29   :  { %393 = shalt.err (!%p390_p4)
}
  0x2a   :  { %s394_s28 = scalar_lea.vmem %s43_s19, 512  ;;  %p399_p6 = scmp.lt.s32.totalorder %s43_s19, %s43_s19 }
  0x2b   :  { %p395_p5 = scmp.ne.s32.totalorder %s43_s19, %s394_s28  ;;  %p400_p7 = scmp.lt.s32.totalorder %s394_s28, %s394_s28 }
  0x2d   :  { %p401_p8 = por %p400_p7, %p399_p6 }
  0x2f   :  { %p402_p9 = pnand %p401_p8, %p395_p5 }
  0x31   :  { %405 = shalt.err (!%p402_p9)
}
  0x32   :  { %48 = dma.hbm_to_vmem [thread:$0]  %s537_s3, 512, %s43_s19, [#allocation7], %s436_s1, %s436_s1, %s437_s15  }
  0x33   :  { %428 = dma.done.wait [#allocation4], 256  }
  0x34   :  { %429 = vsyncadd [#allocation4], 4294967040 }
  0x35   :  { %430 = dma.done.wait [#allocation7], 576  }
  0x36   :  { %431 = vsyncadd [#allocation7], 4294966720  ;;  %v60_v0 = vld [vmem:[#allocation3] sm:$0xf]  ;;  %v62_v1 = vld [vmem:[#allocation3 + $0x4] sm:$0xf]  ;;  %v106_v16 = vlaneseq }
  0x37   :  { %v61_v2 = vld [vmem:[#allocation3 + $0x8] sm:$0xf]  ;;  %v64_v3 = vadd.f32 %v62_v1, %v60_v0  ;;  %v63_v4 = vld [vmem:[#allocation3 + $0xc] sm:$0xf]  ;;  %vm87_vm0 = vcmask 1043456   ;;  %v439_v11 = vmov 0.0  }
  0x38   :  { %v65_v5 = vadd.f32 %v63_v4, %v61_v2  ;;  %v96_v10 = vld [vmem:[#allocation6] sm:$0xf]  ;;  %309 = vmatprep.subr.mxu0 %v439_v11  ;;  %vm440_vm1 = vmmov 0   ;;  %v195_v12 = vld [vmem:[#allocation8] sm:$0xff]  ;;  %v196_v13 = vld [vmem:[#allocation8 + $0x8] sm:$0xff]  ;;  %v441_v14 = vmov 0.0|0.0  }
  0x39   :  { %70 = vst [vmem:[#allocation2] sm:$0xf] %v64_v3  ;;  %311 = vmatprep.mubr.msk.f32.mxu0 %vm440_vm1, %v439_v11  ;;  %310 = vmatpush3.msk.msra.mxu0 %vm87_vm0, %v96_v10  ;;  %v326_v15 = vpack.c.bf16 %v196_v13, %v195_v12  ;;  %v107_v17 = vand.u32 127, %v106_v16  ;;  %v109_v18 = vshrl.u32 %v106_v16, 7  ;;  %vm116_vm2 = vcmask 1041409   ;;  %v197_v27 = vld [vmem:[#allocation8 + $0x10] sm:$0xff] }
  0x3a   :  { %71 = vst [vmem:[#allocation2 + $0x4] sm:$0xf] %v65_v5  ;;  %322 = vmatprep.mubr.msk.f32.mxu1 %vm440_vm1, %v439_v11  ;;  %325 = vmatprep.subr.bf16.mxu1 %v441_v14  ;;  %vm118_vm3 = vcmask 31744   ;;  %v198_v28 = vld [vmem:[#allocation8 + $0x18] sm:$0xff]  ;;  %v297_v30 = vld [vmem:[%s536_s2] ss:$0 sm:$0xff] }
  0x3b   :  { %327 = vmatpush3.bf16.msra.mxu1 %v326_v15  ;;  %v110_v20 = vsub.s32 %v107_v17, %v109_v18  ;;  %v329_v29 = vpack.c.bf16 %v198_v28, %v197_v27  ;;  %vm206_vm4 = vcmask 261120   ;;  %v300_v35 = vld [vmem:[%s538_s4] ss:$0 sm:$0xff]  ;;  %s442_s7 = smov [#allocation9]  }
  0x3c   :  { %328 = vmatprep.subr.bf16.mxu1 %v441_v14  ;;  %s287_s8 = sshll.u32 %s442_s7, 4  ;;  %s288_s8 = int_to_ptr.vmem [resolvable:$true] %s287_s8 }
  0x3d   :  { %s406_s9 = scalar_lea.vmem %s288_s8, 32  ;;  %p411_p11 = scmp.lt.s32.totalorder %s288_s8, %s288_s8 }
  0x3e   :  { %p407_p10 = scmp.ne.s32.totalorder %s288_s8, %s406_s9  ;;  %p412_p12 = scmp.lt.s32.totalorder %s406_s9, %s406_s9 }
  0x3f   :  { %330 = vmatpush3.bf16.msra.mxu1 %v329_v29 }
  0x40   :  { %v85_v6 = vld [vmem:[#allocation2] sm:$0xf]  ;;  %p413_p13 = por %p412_p12, %p411_p11 }
  0x41   :  { %v88_v7 = vsel %vm87_vm0, %v85_v6, 0.0  ;;  %v86_v8 = vld [vmem:[#allocation2 + $0x4] sm:$0xf] }
  0x42   :  { %89 = vadd.xlane.f32.xlu0 %v88_v7  ;;  %v91_v9 = vsel %vm87_vm0, %v86_v8, 0.0  ;;  %p414_p0 = pnand %p413_p13, %p407_p10 }
  0x46   :  { %92 = vadd.xlane.f32.xlu0 %v91_v9 }
  0xcf   :  { %v90_v19 = vpop.xlane.xlu0 %89 }
  0xd0   :  { %v94_v21 = vmul.f32 0.00390625, %v90_v19 }
  0xd2   :  { %v111_v24 = vrot.slane %v94_v21, %v110_v20 }
  0xd3   :  { %v93_v22 = vpop.xlane.xlu0 %92 }
  0xd4   :  { %v95_v23 = vmul.f32 0.00390625, %v93_v22 }
  0xd6   :  { %v115_v25 = vrot.slane %v95_v23, %v110_v20 }
  0xd8   :  { %v117_v26 = vsel %vm116_vm2, %v115_v25, %v111_v24 }
  0xd9   :  { %312 = vmatmul.mubr.msk.f32.vlgmr.msra.gmra.mrb[0].mxu0 %vm118_vm3, %v117_v26 }
 0x1ac   :  { %v190_v31 = vpop.f32.mrb[0].mxu0 }
 0x1ad   :  { %v191_v32 = vadd.f32 %v297_v30, %v190_v31  ;;  %v313_v33 = vpop.f32.mrb[1].mxu0 }
 0x1af   :  { %v194_v34 = vmax.f32 %v191_v32, 0.0 }
 0x1b1   :  { %323 = vmatmul.mubr.msk.f32.vlgmr.msra.gmra.mrb[0].mxu1 %vm206_vm4, %v194_v34 }
 0x284   :  { %v276_v36 = vpop.f32.mrb[0].mxu1 }
 0x285   :  { %v277_v37 = vadd.f32 %v300_v35, %v276_v36  ;;  %v324_v38 = vpop.f32.mrb[1].mxu1 }
 0x287   :  { %280 = vst [vmem:[#allocation9] sm:$0x3] %v277_v37 }
 0x288   :  { %417 = shalt.err (!%p414_p0)
}
 0x289   :  { %s418_s11 = scalar_lea.hbm %s539_s5, 32 }
 0x28a   :  { %p419_p1 = scmp.ne.s32.totalorder %s539_s5, %s418_s11  ;;  %p422_p2 = scmp.lt.u32.totalorder %s418_s11, %s539_s5 }
 0x28c   :  { %p424_p3 = pnand %p422_p2, %p419_p1 }
 0x28e   :  { %427 = shalt.err (!%p424_p3)
}
 0x28f   :  { %290 = dma.vmem_to_hbm [thread:$0]  %s288_s8, 32, %s539_s5, [#allocation5]  }
 0x290   :  { %432 = dma.done.wait [#allocation5], 32  }
 0x291   :  { %433 = vsyncadd [#allocation5], 4294967264 }
 0x292   :  { %294 = vsyncpa [#allocation4], 1 }
 0x293   :  { %295 = vsyncpa [#allocation7], 1 }
 0x294   :  { %296 = vsyncpa [#allocation5], 1 }

// kernel: tpu_custom_call.1
= control target key start
LH: loop header
LB: loop body
LE: loop exit
PB: predicated region body
PF: predicated region fallthrough
CT: control target
= control target key end

     0   :  { %10 = vsyncpa [#allocation4], 0  ;;  %s534_s0 = inlined_call_operand.hbm [shape: f32[2,4,256], index: 0, kind: input, shape index: {}]   ;;  %s535_s1 = inlined_call_operand.hbm [shape: f32[4,32], index: 1, kind: input, shape index: {}]   ;;  %s536_s2 = inlined_call_operand.vmem [shape: f32[1,32], index: 2, kind: input, shape index: {}]   ;;  %s537_s3 = inlined_call_operand.hbm [shape: f32[32,128], index: 3, kind: input, shape index: {}]   ;;  %s538_s4 = inlined_call_operand.vmem [shape: f32[1,128], index: 4, kind: input, shape index: {}]   ;;  %s539_s5 = inlined_call_operand.hbm [shape: f32[2,128], index: 5, kind: output, shape index: {}]  }
   0x1   :  { %11 = vsyncpa [#allocation7], 0 }
   0x2   :  { %12 = vsyncpa [#allocation5], 0  ;;  %s434_s18 = smov [#allocation6]   ;;  %s435_s20 = smov [#allocation3]  }
   0x3   :  { %s31_s19 = sshll.u32 %s434_s18, 4  ;;  %s18_s21 = sshll.u32 %s435_s20, 4  ;;  %s32_s19 = int_to_ptr.vmem [resolvable:$true] %s31_s19  ;;  %s473_s21 = int_to_ptr.vmem [resolvable:$true] %s18_s21 }
   0x4   :  { %s340_s24 = scalar_lea.hbm %s535_s1, 64 }
   0x5   :  { %p341_p0 = scmp.ne.s32.totalorder %s535_s1, %s340_s24  ;;  %p344_p1 = scmp.lt.u32.totalorder %s340_s24, %s535_s1 }
   0x7   :  { %p346_p2 = pnand %p344_p1, %p341_p0 }
   0x9   :  { %349 = shalt.err (!%p346_p2)
}
   0xa   :  { %s350_s29 = scalar_lea.vmem %s32_s19, 64  ;;  %p355_p4 = scmp.lt.s32.totalorder %s32_s19, %s32_s19 }
   0xb   :  { %p351_p3 = scmp.ne.s32.totalorder %s32_s19, %s350_s29  ;;  %p356_p5 = scmp.lt.s32.totalorder %s350_s29, %s350_s29 }
   0xd   :  { %p357_p6 = por %p356_p5, %p355_p4 }
   0xf   :  { %p358_p7 = pnand %p357_p6, %p351_p3 }
  0x11   :  { %361 = shalt.err (!%p358_p7)
}
  0x12   :  { %34 = dma.hbm_to_vmem [thread:$0]  %s535_s1, 64, %s32_s19, [#allocation7]  }
  0x13   :  { %s362_s9 = scalar_lea.hbm %s534_s0, 256 }
  0x14   :  { %p363_p8 = scmp.ne.s32.totalorder %s534_s0, %s362_s9  ;;  %p366_p9 = scmp.lt.u32.totalorder %s362_s9, %s534_s0 }
  0x16   :  { %p368_p10 = pnand %p366_p9, %p363_p8 }
  0x18   :  { %371 = shalt.err (!%p368_p10)
}
  0x19   :  { %s372_s14 = scalar_lea.vmem %s473_s21, 256  ;;  %p377_p12 = scmp.lt.s32.totalorder %s473_s21, %s473_s21 }
  0x1a   :  { %p373_p11 = scmp.ne.s32.totalorder %s473_s21, %s372_s14  ;;  %p378_p13 = scmp.lt.s32.totalorder %s372_s14, %s372_s14 }
  0x1c   :  { %p379_p0 = por %p378_p13, %p377_p12 }
  0x1e   :  { %p380_p1 = pnand %p379_p0, %p373_p11 }
  0x20   :  { %383 = shalt.err (!%p380_p1)
}
  0x21   :  { %s436_s1 = smov 128   ;;  %s437_s15 = smov 8  }
  0x22   :  { %24 = dma.hbm_to_vmem [thread:$0]  %s534_s0, 256, %s473_s21, [#allocation4], %s436_s1, %s436_s1, %s437_s15  }
  0x23   :  { %s438_s18 = smov [#allocation8]   ;;  %s384_s23 = scalar_lea.hbm %s537_s3, 512 }
  0x24   :  { %s42_s19 = sshll.u32 %s438_s18, 4  ;;  %p385_p2 = scmp.ne.s32.totalorder %s537_s3, %s384_s23  ;;  %s43_s19 = int_to_ptr.vmem [resolvable:$true] %s42_s19 }
  0x25   :  { %p388_p3 = scmp.lt.u32.totalorder %s384_s23, %s537_s3 }
  0x27   :  { %p390_p4 = pnand %p388_p3, %p385_p2 }
  0x29   :  { %393 = shalt.err (!%p390_p4)
}
  0x2a   :  { %s394_s28 = scalar_lea.vmem %s43_s19, 512  ;;  %p399_p6 = scmp.lt.s32.totalorder %s43_s19, %s43_s19 }
  0x2b   :  { %p395_p5 = scmp.ne.s32.totalorder %s43_s19, %s394_s28  ;;  %p400_p7 = scmp.lt.s32.totalorder %s394_s28, %s394_s28 }
  0x2d   :  { %p401_p8 = por %p400_p7, %p399_p6 }
  0x2f   :  { %p402_p9 = pnand %p401_p8, %p395_p5 }
  0x31   :  { %405 = shalt.err (!%p402_p9)
}
  0x32   :  { %48 = dma.hbm_to_vmem [thread:$0]  %s537_s3, 512, %s43_s19, [#allocation7], %s436_s1, %s436_s1, %s437_s15  }
  0x33   :  { %428 = dma.done.wait [#allocation4], 256  }
  0x34   :  { %429 = vsyncadd [#allocation4], 4294967040 }
  0x35   :  { %430 = dma.done.wait [#allocation7], 576  }
  0x36   :  { %431 = vsyncadd [#allocation7], 4294966720  ;;  %v60_v0 = vld [vmem:[#allocation3] sm:$0xf]  ;;  %v62_v1 = vld [vmem:[#allocation3 + $0x4] sm:$0xf]  ;;  %v106_v16 = vlaneseq }
  0x37   :  { %v61_v2 = vld [vmem:[#allocation3 + $0x8] sm:$0xf]  ;;  %v64_v3 = vadd.f32 %v62_v1, %v60_v0  ;;  %v63_v4 = vld [vmem:[#allocation3 + $0xc] sm:$0xf]  ;;  %vm87_vm0 = vcmask 1043456   ;;  %v439_v11 = vmov 0.0  }
  0x38   :  { %v65_v5 = vadd.f32 %v63_v4, %v61_v2  ;;  %v96_v10 = vld [vmem:[#allocation6] sm:$0xf]  ;;  %309 = vmatprep.subr.mxu0 %v439_v11  ;;  %vm440_vm1 = vmmov 0   ;;  %v195_v12 = vld [vmem:[#allocation8] sm:$0xff]  ;;  %v196_v13 = vld [vmem:[#allocation8 + $0x8] sm:$0xff]  ;;  %v441_v14 = vmov 0.0|0.0  }
  0x39   :  { %70 = vst [vmem:[#allocation2] sm:$0xf] %v64_v3  ;;  %311 = vmatprep.mubr.msk.f32.mxu0 %vm440_vm1, %v439_v11  ;;  %310 = vmatpush3.msk.msra.mxu0 %vm87_vm0, %v96_v10  ;;  %v326_v15 = vpack.c.bf16 %v196_v13, %v195_v12  ;;  %v107_v17 = vand.u32 127, %v106_v16  ;;  %v109_v18 = vshrl.u32 %v106_v16, 7  ;;  %vm116_vm2 = vcmask 1041409   ;;  %v197_v27 = vld [vmem:[#allocation8 + $0x10] sm:$0xff] }
  0x3a   :  { %71 = vst [vmem:[#allocation2 + $0x4] sm:$0xf] %v65_v5  ;;  %322 = vmatprep.mubr.msk.f32.mxu1 %vm440_vm1, %v439_v11  ;;  %325 = vmatprep.subr.bf16.mxu1 %v441_v14  ;;  %vm118_vm3 = vcmask 31744   ;;  %v198_v28 = vld [vmem:[#allocation8 + $0x18] sm:$0xff]  ;;  %v297_v30 = vld [vmem:[%s536_s2] ss:$0 sm:$0xff] }
  0x3b   :  { %327 = vmatpush3.bf16.msra.mxu1 %v326_v15  ;;  %v110_v20 = vsub.s32 %v107_v17, %v109_v18  ;;  %v329_v29 = vpack.c.bf16 %v198_v28, %v197_v27  ;;  %vm206_vm4 = vcmask 261120   ;;  %v300_v35 = vld [vmem:[%s538_s4] ss:$0 sm:$0xff]  ;;  %s442_s7 = smov [#allocation9]  }
  0x3c   :  { %328 = vmatprep.subr.bf16.mxu1 %v441_v14  ;;  %s287_s8 = sshll.u32 %s442_s7, 4  ;;  %s288_s8 = int_to_ptr.vmem [resolvable:$true] %s287_s8 }
  0x3d   :  { %s406_s9 = scalar_lea.vmem %s288_s8, 32  ;;  %p411_p11 = scmp.lt.s32.totalorder %s288_s8, %s288_s8 }
  0x3e   :  { %p407_p10 = scmp.ne.s32.totalorder %s288_s8, %s406_s9  ;;  %p412_p12 = scmp.lt.s32.totalorder %s406_s9, %s406_s9 }
  0x3f   :  { %330 = vmatpush3.bf16.msra.mxu1 %v329_v29 }
  0x40   :  { %v85_v6 = vld [vmem:[#allocation2] sm:$0xf]  ;;  %p413_p13 = por %p412_p12, %p411_p11 }
  0x41   :  { %v88_v7 = vsel %vm87_vm0, %v85_v6, 0.0  ;;  %v86_v8 = vld [vmem:[#allocation2 + $0x4] sm:$0xf] }
  0x42   :  { %89 = vadd.xlane.f32.xlu0 %v88_v7  ;;  %v91_v9 = vsel %vm87_vm0, %v86_v8, 0.0  ;;  %p414_p0 = pnand %p413_p13, %p407_p10 }
  0x46   :  { %92 = vadd.xlane.f32.xlu0 %v91_v9 }
  0xcf   :  { %v90_v19 = vpop.xlane.xlu0 %89 }
  0xd0   :  { %v94_v21 = vmul.f32 0.00390625, %v90_v19 }
  0xd2   :  { %v111_v24 = vrot.slane %v94_v21, %v110_v20 }
  0xd3   :  { %v93_v22 = vpop.xlane.xlu0 %92 }
  0xd4   :  { %v95_v23 = vmul.f32 0.00390625, %v93_v22 }
  0xd6   :  { %v115_v25 = vrot.slane %v95_v23, %v110_v20 }
  0xd8   :  { %v117_v26 = vsel %vm116_vm2, %v115_v25, %v111_v24 }
  0xd9   :  { %312 = vmatmul.mubr.msk.f32.vlgmr.msra.gmra.mrb[0].mxu0 %vm118_vm3, %v117_v26 }
 0x1ac   :  { %v190_v31 = vpop.f32.mrb[0].mxu0 }
 0x1ad   :  { %v191_v32 = vadd.f32 %v297_v30, %v190_v31  ;;  %v313_v33 = vpop.f32.mrb[1].mxu0 }
 0x1af   :  { %v194_v34 = vmax.f32 %v191_v32, 0.0 }
 0x1b1   :  { %323 = vmatmul.mubr.msk.f32.vlgmr.msra.gmra.mrb[0].mxu1 %vm206_vm4, %v194_v34 }
 0x284   :  { %v276_v36 = vpop.f32.mrb[0].mxu1 }
 0x285   :  { %v277_v37 = vadd.f32 %v300_v35, %v276_v36  ;;  %v324_v38 = vpop.f32.mrb[1].mxu1 }
 0x287   :  { %280 = vst [vmem:[#allocation9] sm:$0x3] %v277_v37 }
 0x288   :  { %417 = shalt.err (!%p414_p0)
}
 0x289   :  { %s418_s11 = scalar_lea.hbm %s539_s5, 32 }
 0x28a   :  { %p419_p1 = scmp.ne.s32.totalorder %s539_s5, %s418_s11  ;;  %p422_p2 = scmp.lt.u32.totalorder %s418_s11, %s539_s5 }
 0x28c   :  { %p424_p3 = pnand %p422_p2, %p419_p1 }
 0x28e   :  { %427 = shalt.err (!%p424_p3)
}
 0x28f   :  { %290 = dma.vmem_to_hbm [thread:$0]  %s288_s8, 32, %s539_s5, [#allocation5]  }
 0x290   :  { %432 = dma.done.wait [#allocation5], 32  }
 0x291   :  { %433 = vsyncadd [#allocation5], 4294967264 }
 0x292   :  { %294 = vsyncpa [#allocation4], 1 }
 0x293   :  { %295 = vsyncpa [#allocation7], 1 }
 0x294   :  { %296 = vsyncpa [#allocation5], 1 }

</bundles_post_ra>
